<compile_context>
chip_gen: v6e
topology: v6e:2x2x1
jax: 0.10.0
libtpu: 0.0.40
codegen_flags: <defaults>
</compile_context>

<pallas_src>
import functools

import jax
import jax.numpy as jnp
from jax.experimental import pallas as pl
from jax.experimental.pallas import tpu as pltpu


_VMEM_LIMIT = 48 * 1024 * 1024          # explicit scoped-VMEM budget (v7x-safe, <64 MiB)
_STATS_TILE_BYTES = 12 * 1024 * 1024    # stats pass double-buffers only the input
_APPLY_TILE_BYTES = 8 * 1024 * 1024     # apply pass double-buffers input AND output
_FUSED_MAX_ELEMS = 1 << 20              # fused single-pass path if N*C*HW <= 1M elements


def _pick_c_block(c, max_cb=128):
    """Channel (sublane) block: multiple of 8 when possible (<=128 so C>=256 gives >=2
    parallel channel blocks), else the full dim (always legal)."""
    if c % 8 != 0:
        return c
    return min(c, max_cb)


def _pick_hw_tile(hw, cb, dtype_bytes, budget):
    """Spatial (lane) tile: multiple of 128 when possible, sized against a VMEM budget."""
    if hw < 128:
        return hw                        # block == full array dim
    max_lanes = max(128, (budget // max(cb * dtype_bytes, 1)) // 128 * 128)
    aligned_cap = (hw // 128) * 128      # largest 128-multiple not exceeding hw
    return min(aligned_cap, max_lanes)


# --------------------------------------------------------------------------------------
# Fused single-pass kernel (whole activation resident in VMEM).
# --------------------------------------------------------------------------------------
def _fused_kernel(x_ref, gamma_ref, beta_ref, o_ref, *, eps, count):
    x = x_ref[...].astype(jnp.float32)                      # (N, C, HW)
    s = jnp.sum(x, axis=2, keepdims=True)                   # (N, C, 1)
    s = jnp.sum(s, axis=0, keepdims=True)                   # (1, C, 1)
    mean = s * (1.0 / count)
    centered = x - mean
    v = jnp.sum(centered * centered, axis=2, keepdims=True)
    v = jnp.sum(v, axis=0, keepdims=True)
    var = v * (1.0 / count)                                  # true two-pass variance
    inv_std = jax.lax.rsqrt(var + eps)
    scale = gamma_ref[...] * inv_std                         # (1, C, 1)
    o_ref[...] = (centered * scale + beta_ref[...]).astype(o_ref.dtype)


# --------------------------------------------------------------------------------------
# Pass 1: per-channel partial sum / sum-of-squares with lane-dense f32 accumulators.
# --------------------------------------------------------------------------------------
def _stats_kernel(x_ref, sum_ref, ssq_ref, *, hw, ht, lanes, t_total,
                  r_steps, total_tiles, has_skip):
    p_idx = pl.program_id(0)
    r_idx = pl.program_id(2)

    @pl.when(r_idx == 0)
    def _():
        sum_ref[...] = jnp.zeros_like(sum_ref)
        ssq_ref[...] = jnp.zeros_like(ssq_ref)

    x = x_ref[...].astype(jnp.float32)                       # (cb, ht)

    def accumulate(xv):
        if lanes > 1:
            # (cb, ht) -> (cb, ht/128, 128): the 128->lane accumulation is pure VALU
            # vreg adds; the single cross-lane reduce happens once in the JAX epilogue.
            xr = xv.reshape(xv.shape[0], ht // lanes, lanes)
            sum_ref[...] += jnp.sum(xr, axis=1)
            ssq_ref[...] += jnp.sum(xr * xr, axis=1)
        else:
            sum_ref[...] += jnp.sum(xv, axis=1, keepdims=True)
            ssq_ref[...] += jnp.sum(xv * xv, axis=1, keepdims=True)

    has_partial = (hw % ht) != 0
    if not has_partial and not has_skip:
        # Every tile is full: zero masking / branching cost.
        accumulate(x)
    else:
        f = p_idx * r_steps + r_idx                # flattened (n, hw-tile) index
        t = f % t_total
        valid = hw - t * ht                        # valid lanes in this tile
        in_range = f < total_tiles

        @pl.when(jnp.logical_and(in_range, valid >= ht))
        def _():
            accumulate(x)                          # full tile: unmasked

        if has_partial:
            @pl.when(jnp.logical_and(in_range, valid < ht))
            def _():
                lane = jax.lax.broadcasted_iota(jnp.int32, x.shape, 1)
                accumulate(jnp.where(lane < valid, x, 0.0))


# --------------------------------------------------------------------------------------
# Pass 2: fused normalize + affine (mean/var/gamma/beta folded into scale/bias).
# --------------------------------------------------------------------------------------
def _apply_kernel(x_ref, scale_ref, bias_ref, o_ref):
    x = x_ref[...].astype(jnp.float32)
    o_ref[...] = (x * scale_ref[...] + bias_ref[...]).astype(o_ref.dtype)


# --------------------------------------------------------------------------------------
# Wrapper
# --------------------------------------------------------------------------------------
def batch_norm_layer(x, gamma, beta, *, eps=1e-5, force_two_pass=False):
    """Forward of BatchNormLayer (training-mode batch statistics).

    x: (N, C, H, W)   gamma, beta: (C,)
    """
    N, C, H, W = x.shape
    HW = H * W
    x3 = x.reshape(N, C, HW)             # contiguous NCHW view: no extra HBM traffic
    gamma_f = gamma.astype(jnp.float32)
    beta_f = beta.astype(jnp.float32)

    # ---- fused single-pass fast path (1R + 1W of HBM) --------------------------------
    if (not force_two_pass) and (N * C * HW <= _FUSED_MAX_ELEMS):
        out3 = pl.pallas_call(
            functools.partial(_fused_kernel, eps=float(eps), count=float(N * HW)),
            out_shape=jax.ShapeDtypeStruct((N, C, HW), x.dtype),
            grid=(1,),
            in_specs=[pl.BlockSpec((N, C, HW), lambda i: (0, 0, 0)),
                      pl.BlockSpec((1, C, 1), lambda i: (0, 0, 0)),
                      pl.BlockSpec((1, C, 1), lambda i: (0, 0, 0))],
            out_specs=pl.BlockSpec((N, C, HW), lambda i: (0, 0, 0)),
            compiler_params=pltpu.CompilerParams(vmem_limit_bytes=_VMEM_LIMIT),
        )(x3, gamma_f.reshape(1, C, 1), beta_f.reshape(1, C, 1))
        return out3.reshape(N, C, H, W)

    itemsize = jnp.dtype(x.dtype).itemsize
    cb = _pick_c_block(C)
    c_blocks = pl.cdiv(C, cb)

    # ---- pass 1: per-channel partial sums over a parallel-partitioned reduction ------
    ht_s = _pick_hw_tile(HW, cb, itemsize, _STATS_TILE_BYTES)
    lanes = 128 if (ht_s % 128 == 0) else 1
    t_total = pl.cdiv(HW, ht_s)
    total_tiles = N * t_total
    # If C offers no megacore parallelism, split the (N x HW-tiles) reduction domain
    # into 2 parallel partitions so both v7x TensorCores stream HBM.
    p_parts = 2 if (c_blocks == 1 and total_tiles >= 2) else 1
    r_steps = pl.cdiv(total_tiles, p_parts)
    has_skip = p_parts * r_steps > total_tiles

    def x_stats_map(p, c, r):
        f = p * r_steps + r
        if has_skip:
            f = jnp.minimum(f, total_tiles - 1)   # clamp; kernel skips the duplicate tile
        return (f // t_total, c, f % t_total)

    sums, ssqs = pl.pallas_call(
        functools.partial(_stats_kernel, hw=HW, ht=ht_s, lanes=lanes, t_total=t_total,
                          r_steps=r_steps, total_tiles=total_tiles, has_skip=has_skip),
        out_shape=(jax.ShapeDtypeStruct((p_parts, C, lanes), jnp.float32),
                   jax.ShapeDtypeStruct((p_parts, C, lanes), jnp.float32)),
        grid=(p_parts, c_blocks, r_steps),
        in_specs=[pl.BlockSpec((None, cb, ht_s), x_stats_map)],
        out_specs=(pl.BlockSpec((None, cb, lanes), lambda p, c, r: (p, c, 0)),
                   pl.BlockSpec((None, cb, lanes), lambda p, c, r: (p, c, 0))),
        compiler_params=pltpu.CompilerParams(
            dimension_semantics=("parallel", "parallel", "arbitrary"),
            vmem_limit_bytes=_VMEM_LIMIT),
    )(x3)

    # ---- tiny per-channel math (C elements) in plain JAX ------------------------------
    count = jnp.float32(N * HW)
    mean = jnp.sum(sums, axis=(0, 2)) / count
    # NOTE: E[x^2] - mean^2 with f32 accumulation; clamp >=0. For channels with
    # |mean| >> std this can lose precision vs. PyTorch's two-pass result.
    var = jnp.maximum(jnp.sum(ssqs, axis=(0, 2)) / count - mean * mean, 0.0)
    inv_std = jax.lax.rsqrt(var + jnp.float32(eps))
    scale = gamma_f * inv_std
    bias = beta_f - mean * scale

    # ---- pass 2: fused normalize + affine ---------------------------------------------
    ht_a = _pick_hw_tile(HW, cb, itemsize, _APPLY_TILE_BYTES)
    out3 = pl.pallas_call(
        _apply_kernel,
        out_shape=jax.ShapeDtypeStruct((N, C, HW), x.dtype),
        grid=(N, c_blocks, pl.cdiv(HW, ht_a)),
        in_specs=[
            pl.BlockSpec((None, cb, ht_a), lambda n, c, h: (n, c, h)),
            pl.BlockSpec((cb, 1), lambda n, c, h: (c, 0)),   # same block every (n, h)
            pl.BlockSpec((cb, 1), lambda n, c, h: (c, 0)),
        ],
        out_specs=pl.BlockSpec((None, cb, ht_a), lambda n, c, h: (n, c, h)),
        compiler_params=pltpu.CompilerParams(
            dimension_semantics=("parallel", "parallel", "parallel"),
            vmem_limit_bytes=_VMEM_LIMIT),
    )(x3, scale.reshape(C, 1), bias.reshape(C, 1))

    return out3.reshape(N, C, H, W)


# TODO(synk): running_mean / running_var EMA buffer updates (PyTorch training-time buffer
# bookkeeping, incl. unbiased-variance correction) are not materialized; they do not affect
# the forward output in training mode.
# TODO(synk): optional channels-last (N*H*W, C) layout for HW < 128 with large C would make
# loads/stores lane-dense for tiny-spatial late-stage feature maps.


if __name__ == "__main__":
    key = jax.random.PRNGKey(0)
    kx, kg, kb = jax.random.split(key, 3)

    N, C, H, W = 2, 4, 16, 16
    x = jax.random.normal(kx, (N, C, H, W), dtype=jnp.float32)
    # Deterministic, non-trivial affine params (PyTorch default is gamma=1, beta=0).
    gamma = 1.0 + 0.1 * jax.random.normal(kg, (C,), dtype=jnp.float32)
    beta = 0.1 * jax.random.normal(kb, (C,), dtype=jnp.float32)

    # Exercise both the fused fast path and the tiled two-pass path.
    out_fused = jax.block_until_ready(batch_norm_layer(x, gamma, beta))
    out_tiled = jax.block_until_ready(batch_norm_layer(x, gamma, beta, force_two_pass=True))

    # cross-check against a pure-JAX reference of BatchNorm2d (training mode)
    mean = jnp.mean(x, axis=(0, 2, 3), keepdims=True)
    var = jnp.mean((x - mean) ** 2, axis=(0, 2, 3), keepdims=True)
    ref = (x - mean) / jnp.sqrt(var + 1e-5) * gamma.reshape(1, C, 1, 1) + beta.reshape(1, C, 1, 1)

    assert out_fused.shape == (N, C, H, W)
    assert out_tiled.shape == (N, C, H, W)
    assert jnp.max(jnp.abs(out_fused - ref)) < 1e-4
    assert jnp.max(jnp.abs(out_tiled - ref)) < 1e-4

    print("KERNEL_OK")
</pallas_src>

<mosaic_0001>
module attributes {stable_mosaic.version = 11 : i64} {
  func.func @_fused_kernel(%arg0: i32, %arg1: memref<2x4x256xf32, #tpu.memory_space<vmem>>, %arg2: memref<1x4x1xf32, #tpu.memory_space<vmem>>, %arg3: memref<1x4x1xf32, #tpu.memory_space<vmem>>, %arg4: memref<2x4x256xf32, #tpu.memory_space<vmem>>) attributes {dimension_semantics = [#tpu.dimension_semantics<arbitrary>], iteration_bounds = array<i64: 1>, scalar_prefetch = 0 : i64, scratch_operands = 0 : i64, tpu.core_type = #tpu.core_type<tc>, window_params = [{pipeline_mode = #tpu.pipeline_mode<synchronous>, transform_indices = @transform_0, window_bounds = array<i64: 2, 4, 256>}, {pipeline_mode = #tpu.pipeline_mode<synchronous>, transform_indices = @transform_1, window_bounds = array<i64: 1, 4, 1>}, {pipeline_mode = #tpu.pipeline_mode<synchronous>, transform_indices = @transform_2, window_bounds = array<i64: 1, 4, 1>}, {pipeline_mode = #tpu.pipeline_mode<synchronous>, transform_indices = @transform_3, window_bounds = array<i64: 2, 4, 256>}]} {
    %c0 = arith.constant 0 : index
    %c0_0 = arith.constant 0 : index
    %c0_1 = arith.constant 0 : index
    %0 = vector.load %arg1[%c0, %c0_0, %c0_1] : memref<2x4x256xf32, #tpu.memory_space<vmem>>, vector<2x4x256xf32>
    %cst = arith.constant dense<0.000000e+00> : vector<2x4xf32>
    %1 = vector.multi_reduction <add>, %0, %cst [2] : vector<2x4x256xf32> to vector<2x4xf32>
    %2 = vector.shape_cast %1 : vector<2x4xf32> to vector<2x4x1xf32>
    %cst_2 = arith.constant dense<0.000000e+00> : vector<4x1xf32>
    %3 = vector.multi_reduction <add>, %2, %cst_2 [0] : vector<2x4x1xf32> to vector<4x1xf32>
    %4 = vector.shape_cast %3 : vector<4x1xf32> to vector<1x4x1xf32>
    %cst_3 = arith.constant 0.001953125 : f32
    %5 = vector.broadcast %cst_3 : f32 to vector<1x4x1xf32>
    %6 = arith.mulf %4, %5 : vector<1x4x1xf32>
    %7 = vector.broadcast %6 : vector<1x4x1xf32> to vector<2x4x256xf32>
    %8 = arith.subf %0, %7 : vector<2x4x256xf32>
    %9 = arith.mulf %8, %8 : vector<2x4x256xf32>
    %cst_4 = arith.constant dense<0.000000e+00> : vector<2x4xf32>
    %10 = vector.multi_reduction <add>, %9, %cst_4 [2] : vector<2x4x256xf32> to vector<2x4xf32>
    %11 = vector.shape_cast %10 : vector<2x4xf32> to vector<2x4x1xf32>
    %cst_5 = arith.constant dense<0.000000e+00> : vector<4x1xf32>
    %12 = vector.multi_reduction <add>, %11, %cst_5 [0] : vector<2x4x1xf32> to vector<4x1xf32>
    %13 = vector.shape_cast %12 : vector<4x1xf32> to vector<1x4x1xf32>
    %cst_6 = arith.constant 0.001953125 : f32
    %14 = vector.broadcast %cst_6 : f32 to vector<1x4x1xf32>
    %15 = arith.mulf %13, %14 : vector<1x4x1xf32>
    %cst_7 = arith.constant 9.99999974E-6 : f32
    %16 = vector.broadcast %cst_7 : f32 to vector<1x4x1xf32>
    %17 = arith.addf %15, %16 : vector<1x4x1xf32>
    %18 = math.rsqrt %17 : vector<1x4x1xf32>
    %c0_8 = arith.constant 0 : index
    %c0_9 = arith.constant 0 : index
    %c0_10 = arith.constant 0 : index
    %19 = vector.load %arg2[%c0_8, %c0_9, %c0_10] : memref<1x4x1xf32, #tpu.memory_space<vmem>>, vector<1x4x1xf32>
    %20 = arith.mulf %19, %18 : vector<1x4x1xf32>
    %21 = vector.broadcast %20 : vector<1x4x1xf32> to vector<2x4x256xf32>
    %22 = arith.mulf %8, %21 : vector<2x4x256xf32>
    %c0_11 = arith.constant 0 : index
    %c0_12 = arith.constant 0 : index
    %c0_13 = arith.constant 0 : index
    %23 = vector.load %arg3[%c0_11, %c0_12, %c0_13] : memref<1x4x1xf32, #tpu.memory_space<vmem>>, vector<1x4x1xf32>
    %24 = vector.broadcast %23 : vector<1x4x1xf32> to vector<2x4x256xf32>
    %25 = arith.addf %22, %24 : vector<2x4x256xf32>
    %c0_14 = arith.constant 0 : index
    %c0_15 = arith.constant 0 : index
    %c0_16 = arith.constant 0 : index
    %26 = vector.load %arg4[%c0_14, %c0_15, %c0_16] : memref<2x4x256xf32, #tpu.memory_space<vmem>>, vector<2x4x256xf32>
    tpu.vector_store %arg4[%c0_14, %c0_15, %c0_16], %25 {strides = array<i32>} : memref<2x4x256xf32, #tpu.memory_space<vmem>>, vector<2x4x256xf32>,
    return
  }
  func.func @transform_0(%arg0: i32) -> (i32, i32, i32) {
    %c0_i32 = arith.constant 0 : i32
    %c0_i32_0 = arith.constant 0 : i32
    %c0_i32_1 = arith.constant 0 : i32
    %c0_i32_2 = arith.constant 0 : i32
    return %c0_i32, %c0_i32_0, %c0_i32_1 : i32, i32, i32
  }
  func.func @transform_1(%arg0: i32) -> (i32, i32, i32) {
    %c0_i32 = arith.constant 0 : i32
    %c0_i32_0 = arith.constant 0 : i32
    %c0_i32_1 = arith.constant 0 : i32
    %c0_i32_2 = arith.constant 0 : i32
    return %c0_i32, %c0_i32_0, %c0_i32_1 : i32, i32, i32
  }
  func.func @transform_2(%arg0: i32) -> (i32, i32, i32) {
    %c0_i32 = arith.constant 0 : i32
    %c0_i32_0 = arith.constant 0 : i32
    %c0_i32_1 = arith.constant 0 : i32
    %c0_i32_2 = arith.constant 0 : i32
    return %c0_i32, %c0_i32_0, %c0_i32_1 : i32, i32, i32
  }
  func.func @transform_3(%arg0: i32) -> (i32, i32, i32) {
    %c0_i32 = arith.constant 0 : i32
    %c0_i32_0 = arith.constant 0 : i32
    %c0_i32_1 = arith.constant 0 : i32
    %c0_i32_2 = arith.constant 0 : i32
    return %c0_i32, %c0_i32_0, %c0_i32_1 : i32, i32, i32
  }
}

</mosaic_0001>

<bundles_post_ra>
// kernel: tpu_custom_call.1
= control target key start
LH: loop header
LB: loop body
LE: loop exit
PB: predicated region body
PF: predicated region fallthrough
CT: control target
= control target key end

     0   :  { %8 = vsyncpa [#allocation3], 0  ;;  %s249_s0 = inlined_call_operand.hbm [shape: f32[2,4,256], index: 0, kind: input, shape index: {}]   ;;  %s250_s1 = inlined_call_operand.vmem [shape: f32[1,4,1], index: 1, kind: input, shape index: {}]   ;;  %s251_s2 = inlined_call_operand.vmem [shape: f32[1,4,1], index: 2, kind: input, shape index: {}]   ;;  %s252_s3 = inlined_call_operand.hbm [shape: f32[2,4,256], index: 3, kind: output, shape index: {}]  }
   0x1   :  { %9 = vsyncpa [#allocation4], 0  ;;  %s193_s12 = smov [#allocation2]  }
   0x2   :  { %s15_s13 = sshll.u32 %s193_s12, 4  ;;  %s16_s13 = int_to_ptr.vmem [resolvable:$true] %s15_s13 }
   0x3   :  { %s157_s14 = scalar_lea.vmem %s16_s13, 256  ;;  %p162_p1 = scmp.lt.s32.totalorder %s16_s13, %s16_s13 }
   0x4   :  { %p158_p0 = scmp.ne.s32.totalorder %s16_s13, %s157_s14  ;;  %p163_p2 = scmp.lt.s32.totalorder %s157_s14, %s157_s14 }
   0x6   :  { %p164_p3 = por %p163_p2, %p162_p1 }
   0x8   :  { %p165_p4 = pnand %p164_p3, %p158_p0 }
   0xa   :  { %168 = shalt.err (!%p165_p4)
}
   0xb   :  { %s194_s15 = smov 128   ;;  %s195_s16 = smov 8  }
   0xc   :  { %21 = dma.hbm_to_vmem [thread:$0]  %s249_s0, 256, %s16_s13, [#allocation3], %s194_s15, %s194_s15, %s195_s16  }
   0xd   :  { %189 = dma.done.wait [#allocation3], 256  }
   0xe   :  { %190 = vsyncadd [#allocation3], 4294967040  ;;  %vm37_vm0 = vcmask 1043456   ;;  %v29_v0 = vld [vmem:[#allocation2] sm:$0xff]  ;;  %v30_v1 = vld [vmem:[#allocation2 + $0x8] sm:$0xff]  ;;  %v56_v12 = vlaneseq  ;;  %v197_v35 = vmov 0  }
   0xf   :  { %v33_v2 = vcombine.high %v29_v0, %v29_v0  ;;  %v38_v3 = vsel %vm37_vm0, %v29_v0, 0.0  ;;  %v34_v4 = vcombine.high %v30_v1, %v30_v1  ;;  %v43_v6 = vsel %vm37_vm0, %v30_v1, 0.0  ;;  %143 = vset.pattern.permute.xlu0 %v197_v35  ;;  %144 = vset.pattern.permute.xlu1 %v197_v35  ;;  %v103_v36 = vld [vmem:[%s251_s2] sm:$0xf]  ;;  %s198_s2 = smov [#allocation5]  }
  0x10   :  { %v196_v10 = vmov 839922192   ;;  %v57_v15 = vshrl.u32 %v56_v12, 7  ;;  %v87_v44 = vld [vmem:[%s250_s1] sm:$0xf]  ;;  %s125_s22 = sshll.u32 %s198_s2, 4  ;;  %s126_s22 = int_to_ptr.vmem [resolvable:$true] %s125_s22 }
  0x11   :  { %v39_v5 = vsel %vm37_vm0, %v33_v2, 0.0  ;;  %v44_v7 = vsel %vm37_vm0, %v34_v4, 0.0  ;;  %v54_v11 = vunpack.c.l.s4 %v196_v10  ;;  %s169_s23 = scalar_lea.vmem %s126_s22, 256  ;;  %p174_p6 = scmp.lt.s32.totalorder %s126_s22, %s126_s22 }
  0x12   :  { %v40_v8 = vadd.f32 %v39_v5, %v38_v3  ;;  %v45_v9 = vadd.f32 %v44_v7, %v43_v6  ;;  %p170_p5 = scmp.ne.s32.totalorder %s126_s22, %s169_s23  ;;  %p175_p7 = scmp.lt.s32.totalorder %s169_s23, %s169_s23 }
  0x13   :  { %v55_v14 = vunpack.c.0.s8 %v54_v11 }
  0x14   :  { %41 = vadd.xlane.f32.xlu0 %v40_v8  ;;  %p176_p8 = por %p175_p7, %p174_p6 }
  0x15   :  { %v58_v19 = vsub.s32 %v55_v14, %v57_v15 }
  0x16   :  { %p177_p9 = pnand %p176_p8, %p170_p5 }
  0x18   :  { %46 = vadd.xlane.f32.xlu0 %v45_v9 }
  0x9d   :  { %v42_v13 = vpop.xlane.xlu0 %41 }
  0x9e   :  { %v48_v17 = vsel %vm37_vm0, %v42_v13, 0.0 }
  0xa1   :  { %v47_v16 = vpop.xlane.xlu0 %46 }
  0xa2   :  { %v49_v18 = vsel %vm37_vm0, %v47_v16, 0.0 }
  0xa3   :  { %v50_v20 = vadd.f32 %v49_v18, %v48_v17 }
  0xa5   :  { %v51_v21 = vmul.f32 0.001953125, %v50_v20 }
  0xa7   :  { %v59_v22 = vrot.slane %v51_v21, %v58_v19 }
  0xa9   :  { %v62_v23 = vsub.f32 %v30_v1, %v59_v22  ;;  %v61_v24 = vsub.f32 %v29_v0, %v59_v22 }
  0xab   :  { %v63_v25 = vmul.f32 %v61_v24, %v61_v24  ;;  %v64_v26 = vmul.f32 %v62_v23, %v62_v23 }
  0xad   :  { %v67_v27 = vcombine.high %v63_v25, %v63_v25  ;;  %v68_v28 = vcombine.high %v64_v26, %v64_v26  ;;  %v71_v29 = vsel %vm37_vm0, %v63_v25, 0.0  ;;  %v76_v33 = vsel %vm37_vm0, %v64_v26, 0.0 }
  0xaf   :  { %v72_v30 = vsel %vm37_vm0, %v67_v27, 0.0  ;;  %v77_v32 = vsel %vm37_vm0, %v68_v28, 0.0 }
  0xb0   :  { %v73_v31 = vadd.f32 %v72_v30, %v71_v29  ;;  %v78_v34 = vadd.f32 %v77_v32, %v76_v33 }
  0xb2   :  { %74 = vadd.xlane.f32.xlu1 %v73_v31 }
  0xb6   :  { %79 = vadd.xlane.f32.xlu1 %v78_v34 }
  0xc7   :  { %106 = vperm.xlu1 %144, %v103_v36  }
 0x13b   :  { %v75_v37 = vpop.xlane.xlu1 %74 }
 0x13c   :  { %v81_v39 = vsel %vm37_vm0, %v75_v37, 0.0 }
 0x13f   :  { %v80_v38 = vpop.xlane.xlu1 %79 }
 0x140   :  { %v82_v40 = vsel %vm37_vm0, %v80_v38, 0.0 }
 0x141   :  { %v83_v41 = vadd.f32 %v82_v40, %v81_v39 }
 0x143   :  { %v84_v42 = vmul.f32 0.001953125, %v83_v41  ;;  %v107_v47 = vpop.permute.xlu1 %106 }
 0x144   :  { %v114_v50 = vrot.slane %v107_v47, %v58_v19 }
 0x145   :  { %v85_v43 = vadd.f32 1e-05, %v84_v42 }
 0x147   :  { %147 = vrsqrt.f32 %v85_v43 }
 0x154   :  { %v148_v45 = vpop.eup %147 }
 0x155   :  { %v88_v46 = vmul.f32 %v148_v45, %v87_v44 }
 0x157   :  { %91 = vperm.xlu0 %143, %v88_v46  }
 0x1d2   :  { %v92_v48 = vpop.permute.xlu0 %91 }
 0x1d3   :  { %v99_v49 = vrot.slane %v92_v48, %v58_v19 }
 0x1d5   :  { %v101_v51 = vmul.f32 %v99_v49, %v61_v24  ;;  %v102_v52 = vmul.f32 %v99_v49, %v62_v23 }
 0x1d7   :  { %v116_v53 = vadd.f32 %v114_v50, %v101_v51  ;;  %v117_v54 = vadd.f32 %v114_v50, %v102_v52 }
 0x1d9   :  { %118 = vst [vmem:[#allocation5] sm:$0xff] %v116_v53  ;;  %119 = vst [vmem:[#allocation5 + $0x8] sm:$0xff] %v117_v54 }
 0x1da   :  { %180 = shalt.err (!%p177_p9)
}
 0x1db   :  { %131 = dma.vmem_to_hbm [thread:$0]  %s126_s22, 256, %s252_s3, [#allocation4], %s194_s15, %s194_s15, %s195_s16  }
 0x1dc   :  { %191 = dma.done.wait [#allocation4], 256  }
 0x1dd   :  { %192 = vsyncadd [#allocation4], 4294967040 }
 0x1de   :  { %135 = vsyncpa [#allocation3], 1 }
 0x1df   :  { %136 = vsyncpa [#allocation4], 1 }

</bundles_post_ra>
